<compile_context>
chip_gen: v7x
topology: tpu7x:2x2x1
jax: 0.10.0
libtpu: 0.0.40
codegen_flags: <defaults>
</compile_context>

<pallas_src>
import jax
import jax.numpy as jnp
from jax import lax
from jax.experimental import pallas as pl
from jax.experimental.pallas import tpu as pltpu


def _ngram_kernel(ids_ref, emb_ref, w1_ref, b1_ref, w2_ref, b2_ref, out_ref):
    # ids_ref: (tm, C)    int32 token ids for this batch tile
    # emb_ref: (Vemb, E)  bf16 embedding table (fully resident in VMEM)
    # w1_ref:  (C*E, H)   bf16 linear1 weight (transposed)
    # b1_ref:  (1, H)     f32 linear1 bias
    # w2_ref:  (H, V)     bf16 linear2 weight (transposed)
    # b2_ref:  (1, V)     f32 linear2 bias
    # out_ref: (tm, V)    f32 log-probs
    ids = ids_ref[...]
    tm, ctx = ids.shape
    vemb, e = emb_ref.shape
    h_dim = w1_ref.shape[1]

    emb = emb_ref[...]                                               # (Vemb, E) bf16
    vocab_iota = lax.broadcasted_iota(jnp.int32, (tm, vemb), 1)

    # linear1 accumulated per context position:
    #   x @ W1 == sum_c x_c @ W1[c*E:(c+1)*E, :]
    # where x_c = one_hot(ids[:, c]) @ emb  (MXU-friendly fused gather).
    h = jnp.zeros((tm, h_dim), jnp.float32)
    for c in range(ctx):  # static unroll, ctx is small
        eq = ids[:, c:c + 1] == vocab_iota                            # (tm, Vemb) bool
        one_hot = jnp.where(eq, 1.0, 0.0).astype(jnp.bfloat16)        # exact 0/1
        x_c = jnp.dot(one_hot, emb,
                      preferred_element_type=jnp.float32)             # (tm, E) f32
        w1_c = w1_ref[c * e:(c + 1) * e, :]                           # (E, H) bf16
        h = h + jnp.dot(x_c.astype(jnp.bfloat16), w1_c,
                        preferred_element_type=jnp.float32)

    h = jnp.maximum(h + b1_ref[...], 0.0)                             # f32 bias + ReLU

    logits = jnp.dot(h.astype(jnp.bfloat16), w2_ref[...],
                     preferred_element_type=jnp.float32) + b2_ref[...]

    # numerically stable log_softmax along the vocab axis (f32)
    m = jnp.max(logits, axis=-1, keepdims=True)
    shifted = logits - m
    lse = jnp.log(jnp.sum(jnp.exp(shifted), axis=-1, keepdims=True))
    out_ref[...] = shifted - lse


def ngram_forward_batched(ids, emb_table, w1, b1, w2, b2, *, tm=8):
    """Batched forward: ids (M, C) int32 -> (M, V) f32 log-probs."""
    m_rows, ctx = ids.shape
    vemb, e = emb_table.shape
    d, h = w1.shape
    v = w2.shape[1]
    assert d == ctx * e
    assert v % 128 == 0, "pad vocab to a multiple of 128 for lane-dense stores"

    mp = pl.cdiv(m_rows, tm) * tm
    if mp != m_rows:
        ids = jnp.pad(ids, ((0, mp - m_rows), (0, 0)))

    # bf16 weights for the MXU; biases stay f32.
    emb_bf = emb_table.astype(jnp.bfloat16)
    w1_bf = w1.astype(jnp.bfloat16)
    w2_bf = w2.astype(jnp.bfloat16)
    b1_2d = b1.reshape(1, h).astype(jnp.float32)
    b2_2d = b2.reshape(1, v).astype(jnp.float32)

    cost = pl.CostEstimate(
        flops=2 * mp * (ctx * vemb * e + d * h + h * v),
        transcendentals=mp * v,
        bytes_accessed=(ids.size * 4 + emb_bf.size * 2 + w1_bf.size * 2
                        + b1_2d.size * 4 + w2_bf.size * 2 + b2_2d.size * 4
                        + mp * v * 4),
    )

    bcast = lambda shape: pl.BlockSpec(shape, lambda i: (0, 0))

    out = pl.pallas_call(
        _ngram_kernel,
        out_shape=jax.ShapeDtypeStruct((mp, v), jnp.float32),
        grid=(mp // tm,),
        in_specs=[
            pl.BlockSpec((tm, ctx), lambda i: (i, 0)),   # ids: tiled over M
            bcast((vemb, e)),                            # embedding table
            bcast((d, h)),                               # w1
            bcast((1, h)),                               # b1
            bcast((h, v)),                               # w2
            bcast((1, v)),                               # b2
        ],
        out_specs=pl.BlockSpec((tm, v), lambda i: (i, 0)),
        compiler_params=pltpu.CompilerParams(
            dimension_semantics=("parallel",),
        ),
        cost_estimate=cost,
    )(ids, emb_bf, w1_bf, b1_2d, w2_bf, b2_2d)
    return out[:m_rows]


def ngram_forward(inputs, emb_table, w1, b1, w2, b2):
    """Single-context forward matching the PyTorch module: (C,) -> (1, V)."""
    return ngram_forward_batched(inputs.reshape(1, -1), emb_table, w1, b1, w2, b2)


if __name__ == "__main__":
    vocab_size = 256
    embedding_dim = 16
    context_size = 8
    hidden = 128
    batch = 16                      # batch of n-gram contexts per call
    d = context_size * embedding_dim  # 128

    key = jax.random.PRNGKey(0)
    k_emb, k_w1, k_b1, k_w2, k_b2, k_in = jax.random.split(key, 6)

    emb_table = jax.random.normal(k_emb, (vocab_size, embedding_dim), jnp.float32)
    # Stored as [in, out] (transposed relative to PyTorch's [out, in]).
    w1 = jax.random.normal(k_w1, (d, hidden), jnp.float32) * 0.05
    b1 = jax.random.normal(k_b1, (hidden,), jnp.float32) * 0.05
    w2 = jax.random.normal(k_w2, (hidden, vocab_size), jnp.float32) * 0.05
    b2 = jax.random.normal(k_b2, (vocab_size,), jnp.float32) * 0.05

    ids = jax.random.randint(k_in, (batch, context_size), 0, vocab_size, jnp.int32)

    log_probs = ngram_forward_batched(ids, emb_table, w1, b1, w2, b2, tm=8)
    log_probs = jax.block_until_ready(log_probs)

    # Shape + normalization sanity checks.
    assert log_probs.shape == (batch, vocab_size)
    total_prob = jnp.sum(jnp.exp(log_probs), axis=-1)
    assert bool(jnp.allclose(total_prob, 1.0, atol=1e-3)), total_prob

    # Reference in plain JAX, mirroring the kernel's bf16 quantization of
    # weights and of the hidden activation fed to the second matmul.
    emb_q = emb_table.astype(jnp.bfloat16).astype(jnp.float32)
    w1_q = w1.astype(jnp.bfloat16).astype(jnp.float32)
    w2_q = w2.astype(jnp.bfloat16).astype(jnp.float32)
    x = jnp.take(emb_q, ids.reshape(-1), axis=0).reshape(batch, -1)
    h_ref = jnp.maximum(x @ w1_q + b1, 0.0)
    h_ref = h_ref.astype(jnp.bfloat16).astype(jnp.float32)
    ref = jax.nn.log_softmax(h_ref @ w2_q + b2, axis=-1)
    max_err = float(jnp.max(jnp.abs(log_probs - ref)))
    assert bool(jnp.allclose(log_probs, ref, atol=2e-3, rtol=2e-3)), max_err

    # Single-context path keeps the original module's (1, V) semantics.
    single = jax.block_until_ready(
        ngram_forward(ids[0], emb_table, w1, b1, w2, b2))
    assert single.shape == (1, vocab_size)
    assert bool(jnp.allclose(single, ref[0:1], atol=2e-3, rtol=2e-3))

    print("KERNEL_OK")
</pallas_src>

<mosaic_0001>
module attributes {stable_mosaic.version = 11 : i64} {
  func.func @_ngram_kernel(%arg0: i32, %arg1: memref<8x8xi32, #tpu.memory_space<vmem>>, %arg2: memref<256x16xbf16, #tpu.memory_space<vmem>>, %arg3: memref<128x128xbf16, #tpu.memory_space<vmem>>, %arg4: memref<1x128xf32, #tpu.memory_space<vmem>>, %arg5: memref<128x256xbf16, #tpu.memory_space<vmem>>, %arg6: memref<1x256xf32, #tpu.memory_space<vmem>>, %arg7: memref<8x256xf32, #tpu.memory_space<vmem>>) attributes {dimension_semantics = [#tpu.dimension_semantics<parallel>], iteration_bounds = array<i64: 2>, scalar_prefetch = 0 : i64, scratch_operands = 0 : i64, tpu.core_type = #tpu.core_type<tc>, window_params = [{transform_indices = @transform_0, window_bounds = array<i64: 8, 8>}, {pipeline_mode = #tpu.pipeline_mode<synchronous>, transform_indices = @transform_1, window_bounds = array<i64: 256, 16>}, {pipeline_mode = #tpu.pipeline_mode<synchronous>, transform_indices = @transform_2, window_bounds = array<i64: 128, 128>}, {pipeline_mode = #tpu.pipeline_mode<synchronous>, transform_indices = @transform_3, window_bounds = array<i64: 1, 128>}, {pipeline_mode = #tpu.pipeline_mode<synchronous>, transform_indices = @transform_4, window_bounds = array<i64: 128, 256>}, {pipeline_mode = #tpu.pipeline_mode<synchronous>, transform_indices = @transform_5, window_bounds = array<i64: 1, 256>}, {transform_indices = @transform_6, window_bounds = array<i64: 8, 256>}]} {
    %c0 = arith.constant 0 : index
    %c0_0 = arith.constant 0 : index
    %0 = vector.load %arg1[%c0, %c0_0] : memref<8x8xi32, #tpu.memory_space<vmem>>, vector<8x8xi32>
    %c0_1 = arith.constant 0 : index
    %c0_2 = arith.constant 0 : index
    %1 = vector.load %arg2[%c0_1, %c0_2] : memref<256x16xbf16, #tpu.memory_space<vmem>>, vector<256x16xbf16>
    %2 = tpu.iota {dimensions = array<i32: 1>} : vector<8x256xi32>
    %cst = arith.constant 0.000000e+00 : f32
    %3 = vector.broadcast %cst : f32 to vector<8x128xf32>
    %4 = vector.extract_strided_slice %0 {offsets = [0, 0], sizes = [8, 1], strides = [1, 1]} : vector<8x8xi32> to vector<8x1xi32>
    %5 = vector.broadcast %4 : vector<8x1xi32> to vector<8x256xi32>
    %6 = arith.cmpi eq, %5, %2 : vector<8x256xi32>
    %cst_3 = arith.constant 1.000000e+00 : f32
    %cst_4 = arith.constant 0.000000e+00 : f32
    %7 = vector.broadcast %cst_3 : f32 to vector<8x256xf32>
    %8 = vector.broadcast %cst_4 : f32 to vector<8x256xf32>
    %9 = arith.select %6, %7, %8 : vector<8x256xi1>, vector<8x256xf32>
    %10 = arith.truncf %9 : vector<8x256xf32> to vector<8x256xbf16>
    %cst_5 = arith.constant dense<0.000000e+00> : vector<8x16xf32>
    %11 = tpu.matmul %10, %1, %cst_5 {dimension_numbers = #tpu.dot_dimension_numbers<[1], [0], [0], [1], [0, 0, 1, 1], [], []>} : vector<8x256xbf16>, vector<256x16xbf16>, vector<8x16xf32> -> vector<8x16xf32>
    %c0_6 = arith.constant 0 : index
    %c0_7 = arith.constant 0 : index
    %12 = vector.load %arg3[%c0_6, %c0_7] : memref<128x128xbf16, #tpu.memory_space<vmem>>, vector<16x128xbf16>
    %13 = arith.truncf %11 : vector<8x16xf32> to vector<8x16xbf16>
    %cst_8 = arith.constant dense<0.000000e+00> : vector<8x128xf32>
    %14 = tpu.matmul %13, %12, %cst_8 {dimension_numbers = #tpu.dot_dimension_numbers<[1], [0], [0], [1], [0, 0, 1, 1], [], []>} : vector<8x16xbf16>, vector<16x128xbf16>, vector<8x128xf32> -> vector<8x128xf32>
    %15 = arith.addf %3, %14 : vector<8x128xf32>
    %16 = vector.extract_strided_slice %0 {offsets = [0, 1], sizes = [8, 1], strides = [1, 1]} : vector<8x8xi32> to vector<8x1xi32>
    %17 = vector.broadcast %16 : vector<8x1xi32> to vector<8x256xi32>
    %18 = arith.cmpi eq, %17, %2 : vector<8x256xi32>
    %cst_9 = arith.constant 1.000000e+00 : f32
    %cst_10 = arith.constant 0.000000e+00 : f32
    %19 = vector.broadcast %cst_9 : f32 to vector<8x256xf32>
    %20 = vector.broadcast %cst_10 : f32 to vector<8x256xf32>
    %21 = arith.select %18, %19, %20 : vector<8x256xi1>, vector<8x256xf32>
    %22 = arith.truncf %21 : vector<8x256xf32> to vector<8x256xbf16>
    %cst_11 = arith.constant dense<0.000000e+00> : vector<8x16xf32>
    %23 = tpu.matmul %22, %1, %cst_11 {dimension_numbers = #tpu.dot_dimension_numbers<[1], [0], [0], [1], [0, 0, 1, 1], [], []>} : vector<8x256xbf16>, vector<256x16xbf16>, vector<8x16xf32> -> vector<8x16xf32>
    %c16 = arith.constant 16 : index
    %c0_12 = arith.constant 0 : index
    %24 = vector.load %arg3[%c16, %c0_12] : memref<128x128xbf16, #tpu.memory_space<vmem>>, vector<16x128xbf16>
    %25 = arith.truncf %23 : vector<8x16xf32> to vector<8x16xbf16>
    %cst_13 = arith.constant dense<0.000000e+00> : vector<8x128xf32>
    %26 = tpu.matmul %25, %24, %cst_13 {dimension_numbers = #tpu.dot_dimension_numbers<[1], [0], [0], [1], [0, 0, 1, 1], [], []>} : vector<8x16xbf16>, vector<16x128xbf16>, vector<8x128xf32> -> vector<8x128xf32>
    %27 = arith.addf %15, %26 : vector<8x128xf32>
    %28 = vector.extract_strided_slice %0 {offsets = [0, 2], sizes = [8, 1], strides = [1, 1]} : vector<8x8xi32> to vector<8x1xi32>
    %29 = vector.broadcast %28 : vector<8x1xi32> to vector<8x256xi32>
    %30 = arith.cmpi eq, %29, %2 : vector<8x256xi32>
    %cst_14 = arith.constant 1.000000e+00 : f32
    %cst_15 = arith.constant 0.000000e+00 : f32
    %31 = vector.broadcast %cst_14 : f32 to vector<8x256xf32>
    %32 = vector.broadcast %cst_15 : f32 to vector<8x256xf32>
    %33 = arith.select %30, %31, %32 : vector<8x256xi1>, vector<8x256xf32>
    %34 = arith.truncf %33 : vector<8x256xf32> to vector<8x256xbf16>
    %cst_16 = arith.constant dense<0.000000e+00> : vector<8x16xf32>
    %35 = tpu.matmul %34, %1, %cst_16 {dimension_numbers = #tpu.dot_dimension_numbers<[1], [0], [0], [1], [0, 0, 1, 1], [], []>} : vector<8x256xbf16>, vector<256x16xbf16>, vector<8x16xf32> -> vector<8x16xf32>
    %c32 = arith.constant 32 : index
    %c0_17 = arith.constant 0 : index
    %36 = vector.load %arg3[%c32, %c0_17] : memref<128x128xbf16, #tpu.memory_space<vmem>>, vector<16x128xbf16>
    %37 = arith.truncf %35 : vector<8x16xf32> to vector<8x16xbf16>
    %cst_18 = arith.constant dense<0.000000e+00> : vector<8x128xf32>
    %38 = tpu.matmul %37, %36, %cst_18 {dimension_numbers = #tpu.dot_dimension_numbers<[1], [0], [0], [1], [0, 0, 1, 1], [], []>} : vector<8x16xbf16>, vector<16x128xbf16>, vector<8x128xf32> -> vector<8x128xf32>
    %39 = arith.addf %27, %38 : vector<8x128xf32>
    %40 = vector.extract_strided_slice %0 {offsets = [0, 3], sizes = [8, 1], strides = [1, 1]} : vector<8x8xi32> to vector<8x1xi32>
    %41 = vector.broadcast %40 : vector<8x1xi32> to vector<8x256xi32>
    %42 = arith.cmpi eq, %41, %2 : vector<8x256xi32>
    %cst_19 = arith.constant 1.000000e+00 : f32
    %cst_20 = arith.constant 0.000000e+00 : f32
    %43 = vector.broadcast %cst_19 : f32 to vector<8x256xf32>
    %44 = vector.broadcast %cst_20 : f32 to vector<8x256xf32>
    %45 = arith.select %42, %43, %44 : vector<8x256xi1>, vector<8x256xf32>
    %46 = arith.truncf %45 : vector<8x256xf32> to vector<8x256xbf16>
    %cst_21 = arith.constant dense<0.000000e+00> : vector<8x16xf32>
    %47 = tpu.matmul %46, %1, %cst_21 {dimension_numbers = #tpu.dot_dimension_numbers<[1], [0], [0], [1], [0, 0, 1, 1], [], []>} : vector<8x256xbf16>, vector<256x16xbf16>, vector<8x16xf32> -> vector<8x16xf32>
    %c48 = arith.constant 48 : index
    %c0_22 = arith.constant 0 : index
    %48 = vector.load %arg3[%c48, %c0_22] : memref<128x128xbf16, #tpu.memory_space<vmem>>, vector<16x128xbf16>
    %49 = arith.truncf %47 : vector<8x16xf32> to vector<8x16xbf16>
    %cst_23 = arith.constant dense<0.000000e+00> : vector<8x128xf32>
    %50 = tpu.matmul %49, %48, %cst_23 {dimension_numbers = #tpu.dot_dimension_numbers<[1], [0], [0], [1], [0, 0, 1, 1], [], []>} : vector<8x16xbf16>, vector<16x128xbf16>, vector<8x128xf32> -> vector<8x128xf32>
    %51 = arith.addf %39, %50 : vector<8x128xf32>
    %52 = vector.extract_strided_slice %0 {offsets = [0, 4], sizes = [8, 1], strides = [1, 1]} : vector<8x8xi32> to vector<8x1xi32>
    %53 = vector.broadcast %52 : vector<8x1xi32> to vector<8x256xi32>
    %54 = arith.cmpi eq, %53, %2 : vector<8x256xi32>
    %cst_24 = arith.constant 1.000000e+00 : f32
    %cst_25 = arith.constant 0.000000e+00 : f32
    %55 = vector.broadcast %cst_24 : f32 to vector<8x256xf32>
    %56 = vector.broadcast %cst_25 : f32 to vector<8x256xf32>
    %57 = arith.select %54, %55, %56 : vector<8x256xi1>, vector<8x256xf32>
    %58 = arith.truncf %57 : vector<8x256xf32> to vector<8x256xbf16>
    %cst_26 = arith.constant dense<0.000000e+00> : vector<8x16xf32>
    %59 = tpu.matmul %58, %1, %cst_26 {dimension_numbers = #tpu.dot_dimension_numbers<[1], [0], [0], [1], [0, 0, 1, 1], [], []>} : vector<8x256xbf16>, vector<256x16xbf16>, vector<8x16xf32> -> vector<8x16xf32>
    %c64 = arith.constant 64 : index
    %c0_27 = arith.constant 0 : index
    %60 = vector.load %arg3[%c64, %c0_27] : memref<128x128xbf16, #tpu.memory_space<vmem>>, vector<16x128xbf16>
    %61 = arith.truncf %59 : vector<8x16xf32> to vector<8x16xbf16>
    %cst_28 = arith.constant dense<0.000000e+00> : vector<8x128xf32>
    %62 = tpu.matmul %61, %60, %cst_28 {dimension_numbers = #tpu.dot_dimension_numbers<[1], [0], [0], [1], [0, 0, 1, 1], [], []>} : vector<8x16xbf16>, vector<16x128xbf16>, vector<8x128xf32> -> vector<8x128xf32>
    %63 = arith.addf %51, %62 : vector<8x128xf32>
    %64 = vector.extract_strided_slice %0 {offsets = [0, 5], sizes = [8, 1], strides = [1, 1]} : vector<8x8xi32> to vector<8x1xi32>
    %65 = vector.broadcast %64 : vector<8x1xi32> to vector<8x256xi32>
    %66 = arith.cmpi eq, %65, %2 : vector<8x256xi32>
    %cst_29 = arith.constant 1.000000e+00 : f32
    %cst_30 = arith.constant 0.000000e+00 : f32
    %67 = vector.broadcast %cst_29 : f32 to vector<8x256xf32>
    %68 = vector.broadcast %cst_30 : f32 to vector<8x256xf32>
    %69 = arith.select %66, %67, %68 : vector<8x256xi1>, vector<8x256xf32>
    %70 = arith.truncf %69 : vector<8x256xf32> to vector<8x256xbf16>
    %cst_31 = arith.constant dense<0.000000e+00> : vector<8x16xf32>
    %71 = tpu.matmul %70, %1, %cst_31 {dimension_numbers = #tpu.dot_dimension_numbers<[1], [0], [0], [1], [0, 0, 1, 1], [], []>} : vector<8x256xbf16>, vector<256x16xbf16>, vector<8x16xf32> -> vector<8x16xf32>
    %c80 = arith.constant 80 : index
    %c0_32 = arith.constant 0 : index
    %72 = vector.load %arg3[%c80, %c0_32] : memref<128x128xbf16, #tpu.memory_space<vmem>>, vector<16x128xbf16>
    %73 = arith.truncf %71 : vector<8x16xf32> to vector<8x16xbf16>
    %cst_33 = arith.constant dense<0.000000e+00> : vector<8x128xf32>
    %74 = tpu.matmul %73, %72, %cst_33 {dimension_numbers = #tpu.dot_dimension_numbers<[1], [0], [0], [1], [0, 0, 1, 1], [], []>} : vector<8x16xbf16>, vector<16x128xbf16>, vector<8x128xf32> -> vector<8x128xf32>
    %75 = arith.addf %63, %74 : vector<8x128xf32>
    %76 = vector.extract_strided_slice %0 {offsets = [0, 6], sizes = [8, 1], strides = [1, 1]} : vector<8x8xi32> to vector<8x1xi32>
    %77 = vector.broadcast %76 : vector<8x1xi32> to vector<8x256xi32>
    %78 = arith.cmpi eq, %77, %2 : vector<8x256xi32>
    %cst_34 = arith.constant 1.000000e+00 : f32
    %cst_35 = arith.constant 0.000000e+00 : f32
    %79 = vector.broadcast %cst_34 : f32 to vector<8x256xf32>
    %80 = vector.broadcast %cst_35 : f32 to vector<8x256xf32>
    %81 = arith.select %78, %79, %80 : vector<8x256xi1>, vector<8x256xf32>
    %82 = arith.truncf %81 : vector<8x256xf32> to vector<8x256xbf16>
    %cst_36 = arith.constant dense<0.000000e+00> : vector<8x16xf32>
    %83 = tpu.matmul %82, %1, %cst_36 {dimension_numbers = #tpu.dot_dimension_numbers<[1], [0], [0], [1], [0, 0, 1, 1], [], []>} : vector<8x256xbf16>, vector<256x16xbf16>, vector<8x16xf32> -> vector<8x16xf32>
    %c96 = arith.constant 96 : index
    %c0_37 = arith.constant 0 : index
    %84 = vector.load %arg3[%c96, %c0_37] : memref<128x128xbf16, #tpu.memory_space<vmem>>, vector<16x128xbf16>
    %85 = arith.truncf %83 : vector<8x16xf32> to vector<8x16xbf16>
    %cst_38 = arith.constant dense<0.000000e+00> : vector<8x128xf32>
    %86 = tpu.matmul %85, %84, %cst_38 {dimension_numbers = #tpu.dot_dimension_numbers<[1], [0], [0], [1], [0, 0, 1, 1], [], []>} : vector<8x16xbf16>, vector<16x128xbf16>, vector<8x128xf32> -> vector<8x128xf32>
    %87 = arith.addf %75, %86 : vector<8x128xf32>
    %88 = vector.extract_strided_slice %0 {offsets = [0, 7], sizes = [8, 1], strides = [1, 1]} : vector<8x8xi32> to vector<8x1xi32>
    %89 = vector.broadcast %88 : vector<8x1xi32> to vector<8x256xi32>
    %90 = arith.cmpi eq, %89, %2 : vector<8x256xi32>
    %cst_39 = arith.constant 1.000000e+00 : f32
    %cst_40 = arith.constant 0.000000e+00 : f32
    %91 = vector.broadcast %cst_39 : f32 to vector<8x256xf32>
    %92 = vector.broadcast %cst_40 : f32 to vector<8x256xf32>
    %93 = arith.select %90, %91, %92 : vector<8x256xi1>, vector<8x256xf32>
    %94 = arith.truncf %93 : vector<8x256xf32> to vector<8x256xbf16>
    %cst_41 = arith.constant dense<0.000000e+00> : vector<8x16xf32>
    %95 = tpu.matmul %94, %1, %cst_41 {dimension_numbers = #tpu.dot_dimension_numbers<[1], [0], [0], [1], [0, 0, 1, 1], [], []>} : vector<8x256xbf16>, vector<256x16xbf16>, vector<8x16xf32> -> vector<8x16xf32>
    %c112 = arith.constant 112 : index
    %c0_42 = arith.constant 0 : index
    %96 = vector.load %arg3[%c112, %c0_42] : memref<128x128xbf16, #tpu.memory_space<vmem>>, vector<16x128xbf16>
    %97 = arith.truncf %95 : vector<8x16xf32> to vector<8x16xbf16>
    %cst_43 = arith.constant dense<0.000000e+00> : vector<8x128xf32>
    %98 = tpu.matmul %97, %96, %cst_43 {dimension_numbers = #tpu.dot_dimension_numbers<[1], [0], [0], [1], [0, 0, 1, 1], [], []>} : vector<8x16xbf16>, vector<16x128xbf16>, vector<8x128xf32> -> vector<8x128xf32>
    %99 = arith.addf %87, %98 : vector<8x128xf32>
    %c0_44 = arith.constant 0 : index
    %c0_45 = arith.constant 0 : index
    %100 = vector.load %arg4[%c0_44, %c0_45] : memref<1x128xf32, #tpu.memory_space<vmem>>, vector<1x128xf32>
    %101 = vector.broadcast %100 : vector<1x128xf32> to vector<8x128xf32>
    %102 = arith.addf %99, %101 : vector<8x128xf32>
    %cst_46 = arith.constant 0.000000e+00 : f32
    %103 = vector.broadcast %cst_46 : f32 to vector<8x128xf32>
    %104 = arith.maximumf %102, %103 : vector<8x128xf32>
    %105 = arith.truncf %104 : vector<8x128xf32> to vector<8x128xbf16>
    %c0_47 = arith.constant 0 : index
    %c0_48 = arith.constant 0 : index
    %106 = vector.load %arg5[%c0_47, %c0_48] : memref<128x256xbf16, #tpu.memory_space<vmem>>, vector<128x256xbf16>
    %cst_49 = arith.constant dense<0.000000e+00> : vector<8x256xf32>
    %107 = tpu.matmul %105, %106, %cst_49 {dimension_numbers = #tpu.dot_dimension_numbers<[1], [0], [0], [1], [0, 0, 1, 1], [], []>} : vector<8x128xbf16>, vector<128x256xbf16>, vector<8x256xf32> -> vector<8x256xf32>
    %c0_50 = arith.constant 0 : index
    %c0_51 = arith.constant 0 : index
    %108 = vector.load %arg6[%c0_50, %c0_51] : memref<1x256xf32, #tpu.memory_space<vmem>>, vector<1x256xf32>
    %109 = vector.broadcast %108 : vector<1x256xf32> to vector<8x256xf32>
    %110 = arith.addf %107, %109 : vector<8x256xf32>
    %cst_52 = arith.constant dense<0xFF800000> : vector<8xf32>
    %111 = vector.multi_reduction <maximumf>, %110, %cst_52 [1] : vector<8x256xf32> to vector<8xf32>
    %112 = vector.shape_cast %111 : vector<8xf32> to vector<8x1xf32>
    %113 = vector.broadcast %112 : vector<8x1xf32> to vector<8x256xf32>
    %114 = arith.subf %110, %113 : vector<8x256xf32>
    %115 = math.exp %114 : vector<8x256xf32>
    %cst_53 = arith.constant dense<0.000000e+00> : vector<8xf32>
    %116 = vector.multi_reduction <add>, %115, %cst_53 [1] : vector<8x256xf32> to vector<8xf32>
    %117 = vector.shape_cast %116 : vector<8xf32> to vector<8x1xf32>
    %118 = math.log %117 : vector<8x1xf32>
    %119 = vector.broadcast %118 : vector<8x1xf32> to vector<8x256xf32>
    %120 = arith.subf %114, %119 : vector<8x256xf32>
    %c0_54 = arith.constant 0 : index
    %c0_55 = arith.constant 0 : index
    %121 = vector.load %arg7[%c0_54, %c0_55] : memref<8x256xf32, #tpu.memory_space<vmem>>, vector<8x256xf32>
    tpu.vector_store %arg7[%c0_54, %c0_55], %120 {strides = array<i32>} : memref<8x256xf32, #tpu.memory_space<vmem>>, vector<8x256xf32>,
    return
  }
  func.func @transform_0(%arg0: i32) -> (i32, i32) {
    %c0_i32 = arith.constant 0 : i32
    %c0_i32_0 = arith.constant 0 : i32
    return %arg0, %c0_i32 : i32, i32
  }
  func.func @transform_1(%arg0: i32) -> (i32, i32) {
    %c0_i32 = arith.constant 0 : i32
    %c0_i32_0 = arith.constant 0 : i32
    %c0_i32_1 = arith.constant 0 : i32
    return %c0_i32, %c0_i32_0 : i32, i32
  }
  func.func @transform_2(%arg0: i32) -> (i32, i32) {
    %c0_i32 = arith.constant 0 : i32
    %c0_i32_0 = arith.constant 0 : i32
    %c0_i32_1 = arith.constant 0 : i32
    return %c0_i32, %c0_i32_0 : i32, i32
  }
  func.func @transform_3(%arg0: i32) -> (i32, i32) {
    %c0_i32 = arith.constant 0 : i32
    %c0_i32_0 = arith.constant 0 : i32
    %c0_i32_1 = arith.constant 0 : i32
    return %c0_i32, %c0_i32_0 : i32, i32
  }
  func.func @transform_4(%arg0: i32) -> (i32, i32) {
    %c0_i32 = arith.constant 0 : i32
    %c0_i32_0 = arith.constant 0 : i32
    %c0_i32_1 = arith.constant 0 : i32
    return %c0_i32, %c0_i32_0 : i32, i32
  }
  func.func @transform_5(%arg0: i32) -> (i32, i32) {
    %c0_i32 = arith.constant 0 : i32
    %c0_i32_0 = arith.constant 0 : i32
    %c0_i32_1 = arith.constant 0 : i32
    return %c0_i32, %c0_i32_0 : i32, i32
  }
  func.func @transform_6(%arg0: i32) -> (i32, i32) {
    %c0_i32 = arith.constant 0 : i32
    %c0_i32_0 = arith.constant 0 : i32
    return %arg0, %c0_i32 : i32, i32
  }
}

</mosaic_0001>

<bundles_post_ra>
// kernel: tpu_custom_call.1
= control target key start
LH: loop header
LB: loop body
LE: loop exit
PB: predicated region body
PF: predicated region fallthrough
CT: control target
= control target key end

     0   :  { %11 = vsyncpa [#allocation3], 0  ;;  %s2560_s0 = inlined_call_operand.vmem [shape: s32[16,8], index: 0, kind: input, shape index: {}]   ;;  %s2561_s1 = inlined_call_operand.vmem [shape: bf16[256,16], index: 1, kind: input, shape index: {}]   ;;  %s2562_s2 = inlined_call_operand.hbm [shape: bf16[128,128], index: 2, kind: input, shape index: {}]   ;;  %s2563_s3 = inlined_call_operand.vmem [shape: f32[1,128], index: 3, kind: input, shape index: {}]   ;;  %s2564_s4 = inlined_call_operand.vmem [shape: bf16[128,256], index: 4, kind: input, shape index: {}]   ;;  %s2565_s5 = inlined_call_operand.vmem [shape: f32[1,256], index: 5, kind: input, shape index: {}]   ;;  %s2566_s6 = inlined_call_operand.hbm [shape: f32[16,256], index: 6, kind: output, shape index: {}]  }
   0x1   :  { %12 = vsyncpa [#allocation4], 0 }
   0x2   :  { %14 = vsyncpa [#allocation4 + $0x1], 0  ;;  %s2080_s21 = smov 0   ;;  %s2082_s22 = smov 0  }
   0x3   :  { %s2084_s23 = smov 0   ;;  %s2086_s24 = smov 0  }
   0x4 LB: > { %s2101_s25 = sadd.s32 4294967295, %s2028_s24   ;;  %s1473_s26 = sadd.s32 4294967294, %s2028_s24   ;;  %s2028_s24 = sphi %s2086_s24, %s2582_s24   ;;  %s2024_s23 = sphi %s2084_s23, %s2581_s23   ;;  %s2020_s22 = sphi %s2082_s22, %s2580_s22   ;;  %s2016_s21 = sphi %s2080_s21, %s2579_s21  }
   0x5   : > { %s2105_s27 = sadd.s32 1, %s2028_s24   ;;  %s158_s28 = sadd.s32 1, %s2024_s23 }
   0x6   : > { %s155_s29 = ssub.s32 %s2028_s24, %s2105_s27  ;;  %p168_p0 = scmp.ne.s32.totalorder %s2024_s23, %s2020_s22 }
   0x7   : > { %p156_p1 = scmp.eq.s32.totalorder %s155_s29, 0  ;;  %p169_p2 = scmp.eq.s32.totalorder %s2101_s25, 1 }
   0x8   : > { %p174_p3 = scmp.ne.s32.totalorder %s2020_s22, %s2016_s21  ;;  %p175_p4 = scmp.eq.s32.totalorder %s1473_s26, 1 }
   0x9   : > { %s2116_s30 = scalar_select %p156_p1, %s2024_s23, %s158_s28  }
   0xa   : > { %p2118_p5 = por %p169_p2, %p168_p0  ;;  %p2122_p6 = por %p175_p4, %p174_p3 }
   0xb   : > { %p1474_p7 = scmp.ge.s32.totalorder %s2028_s24, 1  ;;  %p182_p8 = scmp.lt.s32.totalorder %s2028_s24, 3 }
   0xc   : > { %s2570_s7 = scalar_select %p2118_p5, 1, 0 }
   0xd   : > { %s2571_s8 = scalar_select %p2122_p6, 1, 0 }
   0xe   : > { %p2567_p9 = scmp.eq.s32.totalorder %s2101_s25, 0  ;;  %p2129_p10 = pnand %p1474_p7, %p182_p8 }
   0xf   : > { %s2030_s10 = smov [#allocation2]   ;;  %s1934_s15 = scalar_lea.hbm %s2562_s2, 1024 }
  0x10   : > { %s2572_s9 = scalar_select %p2129_p10, 1, 0 }
  0x11   : > { %s197_s11 = sshll.u32 %s2030_s10, 4  ;;  %p1814_p11 = pneg %p2129_p10  ;;  %s198_s11 = int_to_ptr.vmem [resolvable:$true] %s197_s11 }
  0x12   : > { %p1935_p13 = scmp.ne.s32.totalorder %s2562_s2, %s1934_s15  ;;  %p1941_p3 = scmp.lt.u32.totalorder %s1934_s15, %s2562_s2 }
  0x13   : > { %p2137_p12 = pnand %p2567_p9, %p1814_p11 }
  0x15   : > { %p1936_p0 = pneg %p2137_p12 }
  0x17   : > { %p1937_p1 = pnand %p1936_p0, %p1935_p13 }
  0x19   : > { %p1938_p2 = pneg %p1937_p1 }
  0x1b   : > { %p1943_p4 = pnand %p1941_p3, %p1938_p2 }
  0x1d   : > { %1946 = shalt.err (!%p1943_p4)
}
  0x1e   : > { %s1947_s20 = scalar_lea.vmem %s198_s11, 1024  ;;  %p1955_p9 = scmp.lt.s32.totalorder %s198_s11, %s198_s11 }
  0x1f   : > { %p1948_p7 = scmp.ne.s32.totalorder %s198_s11, %s1947_s20  ;;  %p1956_p6 = scmp.lt.s32.totalorder %s1947_s20, %s1947_s20 }
  0x21   : > { %p1950_p8 = pnand %p1948_p7, %p1936_p0  ;;  %p1957_p5 = por %p1956_p6, %p1955_p9 }
  0x23   : > { %p1951_p11 = pneg %p1950_p8 }
  0x25   : > { %p1958_p10 = pnand %p1957_p5, %p1951_p11 }
  0x27   : > { %1961 = shalt.err (!%p1958_p10)
}
  0x28   : > { %s2031_s26 = smov 64   ;;  %s2032_s28 = smov 4  }
  0x29   : > { %1817 = dma.hbm_to_vmem [thread:$0]  (!%p2137_p12), %s2562_s2, 1024, %s198_s11, [#allocation3], %s2031_s26, %s2031_s26, %s2032_s28  }
  0x2a   : > { %p2574_p13 = scmp.ne.s32.totalorder %s2572_s9, 0 }
  0x2b   : > { %p2575_p1 = scmp.eq.s32.totalorder (!%p2574_p13), %s2101_s25, 0 }
  0x2c   : > { %229 = sbr.rel (%p2574_p13) target bundleno = 2212 (0x8a4), region = 44 }
  0x33   : > { %2007 = dma.done.wait (%p2575_p1), [#allocation3], 1024   ;;  %p2576_p0 = pmov %p2575_p1 }
  0x34   : > { %p258_p5 = scmp.lt.s32.totalorder %s2101_s25, 1  ;;  %v2033_v0 = vmov 0   ;;  %v2034_v1 = vmov 2   ;;  %v2176_v3 = vld [vmem:[%s2561_s1 + $0x40] sm:$0xff]   ;;  %v2187_v5 = vld [vmem:[%s2561_s1 + $0x48] sm:$0xff]   ;;  %v2035_v7 = vmov 1   ;;  %v296_v22 = vlaneseq }
  0x35   : > { %2009 = vsyncadd (%p2576_p0), [#allocation3], 4294966272  ;;  %1871 = vset.pattern.permute.xlu0 %v2033_v0  ;;  %1873 = vset.pattern.permute.xlu1 %v2034_v1  ;;  %v2181_v4 = vld [vmem:[%s2561_s1] sm:$0xff]   ;;  %v2194_v6 = vld [vmem:[%s2561_s1 + $0x8] sm:$0xff]   ;;  %v2036_v20 = vmov 3   ;;  %v2037_v21 = vmov 4  }
  0x36   : > { %s259_s12 = scalar_select %p258_p5, %s2101_s25, 1  ;;  %1568 = vmatprep.subr.bf16.mxu0 %v2176_v3  ;;  %1590 = vmatprep.subr.bf16.mxu1 %v2176_v3  ;;  %v2201_v8 = vld [vmem:[%s2561_s1 + $0x50] sm:$0xff]   ;;  %v2216_v10 = vld [vmem:[%s2561_s1 + $0x58] sm:$0xff]   ;;  %v2230_v12 = vld [vmem:[%s2561_s1 + $0x60] sm:$0xff]   ;;  %v2290_v23 = vand.u32 127, %v296_v22  ;;  %v2039_v30 = vmov 0.0  }
  0x37   : > { %1569 = vmatpush3.bf16.msra.mxu0 %v2181_v4  ;;  %1591 = vmatpush3.bf16.msra.mxu1 %v2181_v4  ;;  %v2209_v9 = vld [vmem:[%s2561_s1 + $0x10] sm:$0xff]   ;;  %v2223_v11 = vld [vmem:[%s2561_s1 + $0x18] sm:$0xff]   ;;  %v2236_v13 = vld [vmem:[%s2561_s1 + $0x20] sm:$0xff]   ;;  %v2038_v27 = vmov 1.0|1.0   ;;  %vm2040_vm12 = vmmov 0  }
  0x38   : > { %s1480_s13 = sshll.u32 %s259_s12, 3  ;;  %1570 = vmatprep.subr.bf16.mxu0 %v2187_v5  ;;  %1592 = vmatprep.subr.bf16.mxu1 %v2187_v5  ;;  %v2243_v14 = vld [vmem:[%s2561_s1 + $0x68] sm:$0xff]   ;;  %v2255_v16 = vld [vmem:[%s2561_s1 + $0x70] sm:$0xff]   ;;  %v2269_v18 = vld [vmem:[%s2561_s1 + $0x78] sm:$0xff]   ;;  %v2293_v24 = vadd.s32 128, %v2290_v23  ;;  %v2041_v33 = vmov 5  }
  0x39   : > { %s261_s9 = scalar_lea.vmem %s2560_s0, %s1480_s13  ;;  %v2250_v15 = vld [vmem:[%s2561_s1 + $0x28] sm:$0xff]   ;;  %v2264_v17 = vld [vmem:[%s2561_s1 + $0x30] sm:$0xff]   ;;  %v2279_v19 = vld [vmem:[%s2561_s1 + $0x38] sm:$0xff]   ;;  %v2042_v60 = vmov 6   ;;  %s255_s29 = sand.u32 1, %s2020_s22  }
  0x3a   : > { %v2169_v2 = vld [vmem:[%s261_s9] sm:$0xff]  ;;  %v1896_v29 = vld [vmem:[#allocation2 + $0x8] sm:$0xff]   ;;  %v1897_v44 = vld [vmem:[#allocation2] sm:$0xff]   ;;  %s1479_s10 = sshll.u32 %s255_s29, 4  ;;  %s1567_s12 = sshll.u32 %s2101_s25, 8 }
  0x3b   : > { %300 = vperm.xlu0 %1871, %v2169_v2   ;;  %599 = vperm.xlu1 %1873, %v2169_v2   ;;  %v1898_v46 = vld [vmem:[#allocation2 + $0x10] sm:$0xff]   ;;  %v1899_v54 = vld [vmem:[#allocation2 + $0x18] sm:$0xff]   ;;  %s257_s13 = scalar_lea.vmem [#allocation5], %s1479_s10  ;;  %s2518_s15 = scalar_lea.hbm %s2566_s6, %s1567_s12 }
  0x3c   : > { %1571 = vmatpush3.bf16.msra.mxu0 %v2194_v6  ;;  %1593 = vmatpush3.bf16.msra.mxu1 %v2194_v6  ;;  %s1402_s11 = sshll.u32 %s257_s13, 4  ;;  %s1388_s16 = scalar_lea.sflag [#allocation4], %s255_s29  ;;  %s2520_s11 = int_to_ptr.vmem [resolvable:$true] %s1402_s11 }
  0x3d   : > { %1572 = vmatprep.subr.bf16.mxu0 %v2201_v8  ;;  %1594 = vmatprep.subr.bf16.mxu1 %v2201_v8  ;;  %s1962_s17 = scalar_lea.vmem %s2520_s11, 256  ;;  %p2577_p9 = scmp.ne.s32.totalorder %s2570_s7, 0 }
  0x3e   : > { %p1963_p6 = scmp.ne.s32.totalorder %s2520_s11, %s1962_s17  ;;  %s2044_s25 = smov [#allocation5]  }
  0x3f   : > { %1872 = vset.pattern.permute.xlu0 %v2035_v7  ;;  %1874 = vset.pattern.permute.xlu1 %v2036_v20  ;;  %s1966_s18 = sshll.u32 %s2044_s25, 4  ;;  %s1967_s18 = int_to_ptr.vmem [resolvable:$false] %s1966_s18 }
  0x40   : > { %448 = vperm.xlu0 %1872, %v2169_v2   ;;  %1573 = vmatpush3.bf16.msra.mxu0 %v2209_v9  ;;  %p1964_p10 = pnand %p1963_p6, %p2577_p9  ;;  %s1968_s19 = scalar_lea.vmem %s1967_s18, 512 }
  0x41   : > { %1595 = vmatpush3.bf16.msra.mxu1 %v2209_v9  ;;  %1574 = vmatprep.subr.bf16.mxu0 %v2216_v10  ;;  %p1969_p2 = scmp.lt.s32.totalorder %s2520_s11, %s1967_s18  ;;  %p1970_p3 = scmp.lt.s32.totalorder %s1968_s19, %s1962_s17 }
  0x42   : > { %1596 = vmatprep.subr.bf16.mxu1 %v2216_v10  ;;  %701 = vperm.xlu1 %1874, %v2169_v2   ;;  %p1965_p12 = pneg %p1964_p10 }
  0x43   : > { %p1971_p4 = por %p1970_p3, %p1969_p2 }
  0x44   : > { %1575 = vmatpush3.bf16.msra.mxu0 %v2223_v11  ;;  %1876 = vset.pattern.permute.xlu0 %v2041_v33 }
  0x45   : > { %1597 = vmatpush3.bf16.msra.mxu1 %v2223_v11  ;;  %1576 = vmatprep.subr.bf16.mxu0 %v2230_v12  ;;  %p1972_p7 = pnand %p1971_p4, %p1965_p12 }
  0x46   : > { %1598 = vmatprep.subr.bf16.mxu1 %v2230_v12  ;;  %1875 = vset.pattern.permute.xlu1 %v2037_v21 }
  0x47   : > { %803 = vperm.xlu1 %1875, %v2169_v2   ;;  %905 = vperm.xlu0 %1876, %v2169_v2  }
  0x48   : > { %1577 = vmatpush3.bf16.msra.mxu0 %v2236_v13 }
  0x49   : > { %1599 = vmatpush3.bf16.msra.mxu1 %v2236_v13  ;;  %1578 = vmatprep.subr.bf16.mxu0 %v2243_v14 }
  0x4a   : > { %1600 = vmatprep.subr.bf16.mxu1 %v2243_v14 }
  0x4b   : > { %1877 = vset.pattern.permute.xlu1 %v2042_v60 }
  0x4c   : > { %1579 = vmatpush3.bf16.msra.mxu0 %v2250_v15  ;;  %1007 = vperm.xlu1 %1877, %v2169_v2  }
  0x4d   : > { %1601 = vmatpush3.bf16.msra.mxu1 %v2250_v15  ;;  %1580 = vmatprep.subr.bf16.mxu0 %v2255_v16 }
  0x4e   : > { %1602 = vmatprep.subr.bf16.mxu1 %v2255_v16 }
  0x50   : > { %1581 = vmatpush3.bf16.msra.mxu0 %v2264_v17 }
  0x51   : > { %1603 = vmatpush3.bf16.msra.mxu1 %v2264_v17  ;;  %1582 = vmatprep.subr.bf16.mxu0 %v2269_v18 }
  0x52   : > { %1604 = vmatprep.subr.bf16.mxu1 %v2269_v18 }
  0x54   : > { %1583 = vmatpush3.bf16.msra.mxu0 %v2279_v19 }
  0x55   : > { %1605 = vmatpush3.bf16.msra.mxu1 %v2279_v19  ;;  %1616 = vmatprep.subr.bf16.mxu0 %v2176_v3 }
  0x56   : > { %1760 = vmatprep.subr.bf16.mxu1 %v2039_v30 }
  0xba   : > { %v301_v25 = vpop.permute.xlu0 %300  ;;  %v600_v26 = vpop.permute.xlu1 %599 }
  0xbb   : > { %vm302_vm0 = vcmp.eq.s32.totalorder %v301_v25, %v2290_v23  ;;  %vm303_vm1 = vcmp.eq.s32.totalorder %v301_v25, %v2293_v24  ;;  %vm602_vm2 = vcmp.eq.s32.totalorder %v600_v26, %v2293_v24  ;;  %vm601_vm10 = vcmp.eq.s32.totalorder %v600_v26, %v2290_v23 }
  0xbc   : > { %vm1499_vm3 = vmpackc.low %vm302_vm0, %vm302_vm0 }
  0xbd   : > { %vm1497_vm4 = vmpackc.low %vm303_vm1, %vm303_vm1  ;;  %vm505_vm1 = vcmask 130048  }
  0xbe   : > { %1498 = vmatprep.mubr.msk.bf16.mxu0 %vm1497_vm4, %v2038_v27  ;;  %vm1509_vm5 = vmpackc.low %vm602_vm2, %vm602_vm2 }
  0xbf   : > { %1500 = vmatmul.mubr.msk.bf16.vlgmr.msra.gmra.mrb[0].mxu0 %vm1499_vm3, %v2038_v27  ;;  %v449_v28 = vpop.permute.xlu0 %448  ;;  %vm1511_vm11 = vmpackc.low %vm601_vm10, %vm601_vm10 }
  0xc0   : > { %1617 = vmatpush3.bf16.msra.mxu0 %v2181_v4  ;;  %vm450_vm6 = vcmp.eq.s32.totalorder %v449_v28, %v2290_v23  ;;  %vm451_vm7 = vcmp.eq.s32.totalorder %v449_v28, %v2293_v24  ;;  %1510 = vmatprep.mubr.msk.bf16.mxu0 %vm1509_vm5, %v2038_v27 }
  0xc1   : > { %vm1503_vm8 = vmpackc.low %vm450_vm6, %vm450_vm6  ;;  %1618 = vmatprep.subr.bf16.mxu0 %v2187_v5  ;;  %v702_v31 = vpop.permute.xlu1 %701 }
  0xc2   : > { %vm1501_vm9 = vmpackc.low %vm451_vm7, %vm451_vm7  ;;  %vm704_vm2 = vcmp.eq.s32.totalorder %v702_v31, %v2293_v24  ;;  %vm703_vm4 = vcmp.eq.s32.totalorder %v702_v31, %v2290_v23 }
  0xc3   : > { %1502 = vmatprep.mubr.msk.bf16.mxu1 %vm1501_vm9, %v2038_v27  ;;  %vm1515_vm3 = vmpackc.low %vm704_vm2, %vm704_vm2 }
  0xc4   : > { %1619 = vmatpush3.bf16.msra.mxu0 %v2194_v6  ;;  %1504 = vmatmul.mubr.msk.bf16.vlgmr.msra.gmra.mrb[0].mxu1 %vm1503_vm8, %v2038_v27  ;;  %vm1517_vm5 = vmpackc.low %vm703_vm4, %vm703_vm4 }
  0xc5   : > { %1620 = vmatprep.subr.bf16.mxu0 %v2201_v8  ;;  %1761 = vmatpush3.bf16.msra.mxu1 %v1896_v29 }
  0xc6   : > { %1762 = vmatprep.mubr.msk.bf16.mxu1 %vm2040_vm12, %v2039_v30  ;;  %1766 = vmatprep.subr.bf16.mxu1 %v2039_v30  ;;  %v804_v32 = vpop.permute.xlu1 %803 }
  0xc7   : > { %vm805_vm13 = vcmp.eq.s32.totalorder %v804_v32, %v2290_v23  ;;  %vm806_vm14 = vcmp.eq.s32.totalorder %v804_v32, %v2293_v24 }
  0xc8   : > { %1621 = vmatpush3.bf16.msra.mxu0 %v2209_v9  ;;  %vm1521_vm15 = vmpackc.low %vm806_vm14, %vm806_vm14 }
  0xc9   : > { %1622 = vmatprep.subr.bf16.mxu0 %v2216_v10  ;;  %vm1523_vm0 = vmpackc.low %vm805_vm13, %vm805_vm13 }
  0xcc   : > { %1623 = vmatpush3.bf16.msra.mxu0 %v2223_v11 }
  0xcd   : > { %1624 = vmatprep.subr.bf16.mxu0 %v2230_v12 }
  0xd0   : > { %1625 = vmatpush3.bf16.msra.mxu0 %v2236_v13 }
  0xd1   : > { %1626 = vmatprep.subr.bf16.mxu0 %v2243_v14 }
  0xd4   : > { %1627 = vmatpush3.bf16.msra.mxu0 %v2250_v15 }
  0xd5   : > { %1628 = vmatprep.subr.bf16.mxu0 %v2255_v16 }
  0xd8   : > { %1629 = vmatpush3.bf16.msra.mxu0 %v2264_v17 }
  0xd9   : > { %1630 = vmatprep.subr.bf16.mxu0 %v2269_v18 }
  0xdc   : > { %1631 = vmatpush3.bf16.msra.mxu0 %v2279_v19 }
  0xdd   : > { %1664 = vmatprep.subr.bf16.mxu0 %v2176_v3 }
  0xdf   : > { %1512 = vmatmul.mubr.msk.bf16.vlgmr.msra.gmra.mrb[4].mxu0 %vm1511_vm11, %v2038_v27 }
  0xe0   : > { %1665 = vmatpush3.bf16.msra.mxu0 %v2181_v4  ;;  %1522 = vmatprep.mubr.msk.bf16.mxu0 %vm1521_vm15, %v2038_v27 }
  0xe1   : > { %1666 = vmatprep.subr.bf16.mxu0 %v2187_v5 }
  0xe4   : > { %1667 = vmatpush3.bf16.msra.mxu0 %v2194_v6 }
  0xe5   : > { %1668 = vmatprep.subr.bf16.mxu0 %v2201_v8 }
  0xe8   : > { %1669 = vmatpush3.bf16.msra.mxu0 %v2209_v9 }
  0xe9   : > { %1670 = vmatprep.subr.bf16.mxu0 %v2216_v10 }
  0xec   : > { %1671 = vmatpush3.bf16.msra.mxu0 %v2223_v11 }
  0xed   : > { %1672 = vmatprep.subr.bf16.mxu0 %v2230_v12 }
  0xf0   : > { %1673 = vmatpush3.bf16.msra.mxu0 %v2236_v13 }
  0xf1   : > { %1674 = vmatprep.subr.bf16.mxu0 %v2243_v14 }
  0xf4   : > { %1675 = vmatpush3.bf16.msra.mxu0 %v2250_v15 }
  0xf5   : > { %1676 = vmatprep.subr.bf16.mxu0 %v2255_v16 }
  0xf8   : > { %1677 = vmatpush3.bf16.msra.mxu0 %v2264_v17 }
  0xf9   : > { %1678 = vmatprep.subr.bf16.mxu0 %v2269_v18 }
  0xfc   : > { %1679 = vmatpush3.bf16.msra.mxu0 %v2279_v19 }
  0xfd   : > { %1790 = vmatprep.subr.bf16.mxu0 %v2039_v30 }
  0xff   : > { %1524 = vmatmul.mubr.msk.bf16.vlgmr.msra.gmra.mrb[8].mxu0 %vm1523_vm0, %v2038_v27 }
 0x100   : > { %1792 = vmatprep.mubr.msk.bf16.mxu0 %vm2040_vm12, %v2039_v30 }
 0x192   : > { %v1584_v34 = vpop.f32.mrb[0].mxu0 }
 0x193   : > { %v1585_v35 = vpop.f32.mrb[1].mxu0 }
 0x194   : > { %v1586_v36 = vadd.f32 %v1585_v35, %v1584_v34  ;;  %v1587_v37 = vpop.f32.mrb[2].mxu0 }
 0x195   : > { %v1588_v38 = vpop.f32.mrb[3].mxu0 }
 0x196   : > { %v446_v47 = vpack.c.bf16 %v1586_v36, %v1586_v36 }
 0x197   : > { %v1606_v39 = vpop.f32.mrb[0].mxu1 }
 0x198   : > { %v1607_v40 = vpop.f32.mrb[1].mxu1 }
 0x199   : > { %v1608_v41 = vadd.f32 %v1607_v40, %v1606_v39  ;;  %v1609_v42 = vpop.f32.mrb[2].mxu1  ;;  %v1900_v39 = vld [vmem:[#allocation2 + $0x20] sm:$0xff]  }
 0x19a   : > { %v1610_v43 = vpop.f32.mrb[3].mxu1 }
 0x19b   : > { %v498_v45 = vpack.c.bf16 %v1608_v41, %v1608_v41  ;;  %v906_v41 = vpop.permute.xlu0 %905  ;;  %v1901_v43 = vld [vmem:[#allocation2 + $0x28] sm:$0xff]  }
 0x19c   : > { %vm908_vm6 = vcmp.eq.s32.totalorder %v906_v41, %v2293_v24  ;;  %vm907_vm8 = vcmp.eq.s32.totalorder %v906_v41, %v2290_v23  ;;  %1791 = vmatpush3.bf16.msra.mxu0 %v1901_v43  ;;  %v1545_v41 = vld [vmem:[%s2563_s3] ss:$0 sm:$0xff] }
 0x19d   : > { %1763 = vmatmul.mubr.msk.bf16.vlgmr.msra.gmra.mrb[4].mxu1 %vm505_vm1, %v498_v45  ;;  %vm1527_vm7 = vmpackc.low %vm908_vm6, %vm908_vm6  ;;  %1712 = vmatprep.subr.bf16.mxu0 %v2176_v3 }
 0x19e   : > { %1767 = vmatpush3.bf16.msra.mxu1 %v1897_v44  ;;  %1768 = vmatprep.mubr.msk.bf16.mxu1 %vm2040_vm12, %v2039_v30  ;;  %vm1529_vm9 = vmpackc.low %vm907_vm8, %vm907_vm8  ;;  %v2043_v44 = vmov 7  }
 0x19f   : > { %1772 = vmatprep.subr.bf16.mxu1 %v2039_v30  ;;  %1878 = vset.pattern.permute.xlu1 %v2043_v44 }
 0x1a0   : > { %1879 = vset.pattern.permute.xlu0 %v2043_v44  ;;  %1109 = vperm.xlu1 %1878, %v2169_v2   ;;  %v1902_v2 = vld [vmem:[#allocation2 + $0x30] sm:$0xff]  }
 0x1a5   : > { %1769 = vmatmul.mubr.msk.bf16.vlgmr.msra.gmra.mrb[8].mxu1 %vm505_vm1, %v446_v47 }
 0x1a6   : > { %1773 = vmatpush3.bf16.msra.mxu1 %v1898_v46  ;;  %1774 = vmatprep.mubr.msk.bf16.mxu1 %vm2040_vm12, %v2039_v30 }
 0x1a7   : > { %1640 = vmatprep.subr.bf16.mxu1 %v2176_v3 }
 0x1b2   : > { %v1632_v48 = vpop.f32.mrb[4].mxu0 }
 0x1b3   : > { %v1633_v49 = vpop.f32.mrb[5].mxu0 }
 0x1b4   : > { %v1634_v50 = vadd.f32 %v1633_v49, %v1632_v48  ;;  %v1635_v51 = vpop.f32.mrb[6].mxu0 }
 0x1b5   : > { %v1636_v52 = vpop.f32.mrb[7].mxu0 }
 0x1b6   : > { %v649_v53 = vpack.c.bf16 %v1634_v50, %v1634_v50 }
 0x1b8   : > { %1775 = vmatmul.mubr.msk.bf16.vlgmr.msra.gmra.mrb[12].mxu1 %vm505_vm1, %v649_v53 }
 0x1b9   : > { %1641 = vmatpush3.bf16.msra.mxu1 %v2181_v4  ;;  %1516 = vmatprep.mubr.msk.bf16.mxu1 %vm1515_vm3, %v2038_v27 }
 0x1ba   : > { %1642 = vmatprep.subr.bf16.mxu1 %v2187_v5 }
 0x1bd   : > { %1643 = vmatpush3.bf16.msra.mxu1 %v2194_v6 }
 0x1be   : > { %1644 = vmatprep.subr.bf16.mxu1 %v2201_v8 }
 0x1c1   : > { %1645 = vmatpush3.bf16.msra.mxu1 %v2209_v9 }
 0x1c2   : > { %1646 = vmatprep.subr.bf16.mxu1 %v2216_v10 }
 0x1c5   : > { %1647 = vmatpush3.bf16.msra.mxu1 %v2223_v11 }
 0x1c6   : > { %1648 = vmatprep.subr.bf16.mxu1 %v2230_v12 }
 0x1c9   : > { %1649 = vmatpush3.bf16.msra.mxu1 %v2236_v13 }
 0x1ca   : > { %1650 = vmatprep.subr.bf16.mxu1 %v2243_v14 }
 0x1cd   : > { %1651 = vmatpush3.bf16.msra.mxu1 %v2250_v15 }
 0x1ce   : > { %1652 = vmatprep.subr.bf16.mxu1 %v2255_v16 }
 0x1d1   : > { %1653 = vmatpush3.bf16.msra.mxu1 %v2264_v17 }
 0x1d2   : > { %1654 = vmatprep.subr.bf16.mxu1 %v2269_v18  ;;  %v1680_v55 = vpop.f32.mrb[8].mxu0 }
 0x1d3   : > { %v1681_v56 = vpop.f32.mrb[9].mxu0 }
 0x1d4   : > { %v1682_v57 = vadd.f32 %v1681_v56, %v1680_v55  ;;  %v1683_v58 = vpop.f32.mrb[10].mxu0  ;;  %v1008_v55 = vpop.permute.xlu1 %1007 }
 0x1d5   : > { %1655 = vmatpush3.bf16.msra.mxu1 %v2279_v19  ;;  %v1684_v59 = vpop.f32.mrb[11].mxu0  ;;  %vm1010_vm10 = vcmp.eq.s32.totalorder %v1008_v55, %v2293_v24  ;;  %vm1009_vm13 = vcmp.eq.s32.totalorder %v1008_v55, %v2290_v23 }
 0x1d6   : > { %1778 = vmatprep.subr.bf16.mxu1 %v2039_v30  ;;  %v853_v42 = vpack.c.bf16 %v1682_v57, %v1682_v57  ;;  %vm1533_vm11 = vmpackc.low %vm1010_vm10, %vm1010_vm10 }
 0x1d7   : > { %vm1535_vm14 = vmpackc.low %vm1009_vm13, %vm1009_vm13 }
 0x1d8   : > { %1518 = vmatmul.mubr.msk.bf16.vlgmr.msra.gmra.mrb[16].mxu1 %vm1517_vm5, %v2038_v27 }
 0x1d9   : > { %1780 = vmatprep.mubr.msk.bf16.mxu1 %vm2040_vm12, %v2039_v30  ;;  %1779 = vmatpush3.bf16.msra.mxu1 %v1899_v54 }
 0x1da   : > { %1784 = vmatprep.subr.bf16.mxu1 %v2039_v30 }
 0x270   : > { %v543_v61 = vpop.f32.mrb[4].mxu1 }
 0x271   : > { %v1764_v62 = vpop.f32.mrb[5].mxu1 }
 0x272   : > { %v546_v63 = vpop.f32.mrb[6].mxu1 }
 0x273   : > { %v1765_v1 = vpop.f32.mrb[7].mxu1 }
 0x278   : > { %v592_v7 = vpop.f32.mrb[8].mxu1 }
 0x279   : > { %v593_v20 = vadd.f32 %v592_v7, %v543_v61  ;;  %v1770_v21 = vpop.f32.mrb[9].mxu1 }
 0x27a   : > { %v595_v25 = vpop.f32.mrb[10].mxu1  ;;  %v1110_v21 = vpop.permute.xlu1 %1109 }
 0x27b   : > { %v1771_v26 = vpop.f32.mrb[11].mxu1  ;;  %vm1112_vm15 = vcmp.eq.s32.totalorder %v1110_v21, %v2293_v24  ;;  %v1910_v24 = vld [vmem:[%s2564_s4 + $0x20] ss:$8 sps:$4 sm:$0xff]  }
 0x27c   : > { %vm1539_vm0 = vmpackc.low %vm1112_vm15, %vm1112_vm15 }
 0x28b   : > { %v693_v28 = vpop.f32.mrb[12].mxu1 }
 0x28c   : > { %v699_v29 = vadd.f32 %v693_v28, %v593_v20  ;;  %v1776_v31 = vpop.f32.mrb[13].mxu1 }
 0x28d   : > { %v696_v32 = vpop.f32.mrb[14].mxu1 }
 0x28e   : > { %v1777_v33 = vpop.f32.mrb[15].mxu1 }
 0x28f   : > { %v1916_v33 = vld [vmem:[%s2564_s4 + $0x40] ss:$8 sps:$4 sm:$0xff]  }
 0x2ab   : > { %v1656_v34 = vpop.f32.mrb[16].mxu1 }
 0x2ac   : > { %v1657_v35 = vpop.f32.mrb[17].mxu1 }
 0x2ad   : > { %v1658_v36 = vadd.f32 %v1657_v35, %v1656_v34  ;;  %v1659_v37 = vpop.f32.mrb[18].mxu1  ;;  %v1921_v34 = vld [vmem:[%s2564_s4 + $0x54] ss:$8 sps:$4 sm:$0xff]   ;;  %v1919_v35 = vld [vmem:[%s2564_s4 + $0x50] ss:$8 sps:$4 sm:$0xff]  }
 0x2ae   : > { %v1660_v38 = vpop.f32.mrb[19].mxu1  ;;  %v1922_v37 = vld [vmem:[%s2564_s4 + $0x60] ss:$8 sps:$4 sm:$0xff]  }
 0x2af   : > { %v751_v40 = vpack.c.bf16 %v1658_v36, %v1658_v36  ;;  %v1924_v36 = vld [vmem:[%s2564_s4 + $0x64] ss:$8 sps:$4 sm:$0xff]   ;;  %v1927_v38 = vld [vmem:[%s2564_s4 + $0x74] ss:$8 sps:$4 sm:$0xff]  }
 0x2b1   : > { %1781 = vmatmul.mubr.msk.bf16.vlgmr.msra.gmra.mrb[20].mxu1 %vm505_vm1, %v751_v40 }
 0x2b2   : > { %1785 = vmatpush3.bf16.msra.mxu1 %v1900_v39  ;;  %1786 = vmatprep.mubr.msk.bf16.mxu1 %vm2040_vm12, %v2039_v30  ;;  %v1925_v39 = vld [vmem:[%s2564_s4 + $0x70] ss:$8 sps:$4 sm:$0xff]  }
 0x2b3   : > { %1688 = vmatprep.subr.bf16.mxu1 %v2176_v3 }
 0x2b9   : > { %1787 = vmatmul.mubr.msk.bf16.vlgmr.msra.gmra.mrb[24].mxu1 %vm505_vm1, %v853_v42 }
 0x2ba   : > { %1689 = vmatpush3.bf16.msra.mxu1 %v2181_v4  ;;  %1528 = vmatprep.mubr.msk.bf16.mxu1 %vm1527_vm7, %v2038_v27 }
 0x2bb   : > { %1690 = vmatprep.subr.bf16.mxu1 %v2187_v5 }
 0x2be   : > { %1691 = vmatpush3.bf16.msra.mxu1 %v2194_v6 }
 0x2bf   : > { %1692 = vmatprep.subr.bf16.mxu1 %v2201_v8 }
 0x2c2   : > { %1693 = vmatpush3.bf16.msra.mxu1 %v2209_v9 }
 0x2c3   : > { %1694 = vmatprep.subr.bf16.mxu1 %v2216_v10 }
 0x2c6   : > { %1695 = vmatpush3.bf16.msra.mxu1 %v2223_v11 }
 0x2c7   : > { %1696 = vmatprep.subr.bf16.mxu1 %v2230_v12 }
 0x2ca   : > { %1697 = vmatpush3.bf16.msra.mxu1 %v2236_v13 }
 0x2cb   : > { %1698 = vmatprep.subr.bf16.mxu1 %v2243_v14 }
 0x2ce   : > { %1699 = vmatpush3.bf16.msra.mxu1 %v2250_v15 }
 0x2cf   : > { %1700 = vmatprep.subr.bf16.mxu1 %v2255_v16 }
 0x2d2   : > { %1701 = vmatpush3.bf16.msra.mxu1 %v2264_v17 }
 0x2d3   : > { %1702 = vmatprep.subr.bf16.mxu1 %v2269_v18 }
 0x2d6   : > { %1703 = vmatpush3.bf16.msra.mxu1 %v2279_v19 }
 0x2d7   : > { %1796 = vmatprep.subr.bf16.mxu1 %v2039_v30 }
 0x2d9   : > { %1530 = vmatmul.mubr.msk.bf16.vlgmr.msra.gmra.mrb[28].mxu1 %vm1529_vm9, %v2038_v27 }
 0x2da   : > { %1798 = vmatprep.mubr.msk.bf16.mxu1 %vm2040_vm12, %v2039_v30  ;;  %1797 = vmatpush3.bf16.msra.mxu1 %v1902_v2 }
 0x2db   : > { %1736 = vmatprep.subr.bf16.mxu1 %v2176_v3  ;;  %v1903_v3 = vld [vmem:[#allocation2 + $0x38] sm:$0xff]  }
 0x384   : > { %v795_v45 = vpop.f32.mrb[20].mxu1 }
 0x385   : > { %v801_v46 = vadd.f32 %v795_v45, %v699_v29  ;;  %v1782_v47 = vpop.f32.mrb[21].mxu1 }
 0x386   : > { %v798_v48 = vpop.f32.mrb[22].mxu1 }
 0x387   : > { %v1783_v49 = vpop.f32.mrb[23].mxu1 }
 0x388   : > { %v1239_v49 = vshrl.u32 %v296_v22, 7 }
 0x38c   : > { %v897_v50 = vpop.f32.mrb[24].mxu1 }
 0x38d   : > { %v903_v51 = vadd.f32 %v897_v50, %v801_v46  ;;  %v1788_v52 = vpop.f32.mrb[25].mxu1  ;;  %v1240_v50 = vsub.s32 0, %v1239_v49 }
 0x38e   : > { %v900_v53 = vpop.f32.mrb[26].mxu1  ;;  %v1244_v52 = vsub.s32 1, %v1239_v49 }
 0x38f   : > { %v1789_v54 = vpop.f32.mrb[27].mxu1 }
 0x3ac   : > { %v1704_v56 = vpop.f32.mrb[28].mxu1 }
 0x3ad   : > { %v1705_v57 = vpop.f32.mrb[29].mxu1 }
 0x3ae   : > { %v1706_v58 = vadd.f32 %v1705_v57, %v1704_v56  ;;  %v1707_v59 = vpop.f32.mrb[30].mxu1 }
 0x3af   : > { %v1708_v60 = vpop.f32.mrb[31].mxu1 }
 0x3b0   : > { %v955_v61 = vpack.c.bf16 %v1706_v58, %v1706_v58 }
 0x3b2   : > { %1793 = vmatmul.mubr.msk.bf16.vlgmr.msra.gmra.mrb[12].mxu0 %vm505_vm1, %v955_v61 }
 0x3b3   : > { %1713 = vmatpush3.bf16.msra.mxu0 %v2181_v4  ;;  %1534 = vmatprep.mubr.msk.bf16.mxu0 %vm1533_vm11, %v2038_v27 }
 0x3b4   : > { %1714 = vmatprep.subr.bf16.mxu0 %v2187_v5 }
 0x3b7   : > { %1715 = vmatpush3.bf16.msra.mxu0 %v2194_v6 }
 0x3b8   : > { %1716 = vmatprep.subr.bf16.mxu0 %v2201_v8 }
 0x3bb   : > { %1717 = vmatpush3.bf16.msra.mxu0 %v2209_v9 }
 0x3bc   : > { %1718 = vmatprep.subr.bf16.mxu0 %v2216_v10 }
 0x3bf   : > { %1719 = vmatpush3.bf16.msra.mxu0 %v2223_v11 }
 0x3c0   : > { %1720 = vmatprep.subr.bf16.mxu0 %v2230_v12 }
 0x3c3   : > { %1721 = vmatpush3.bf16.msra.mxu0 %v2236_v13 }
 0x3c4   : > { %1722 = vmatprep.subr.bf16.mxu0 %v2243_v14 }
 0x3c7   : > { %1723 = vmatpush3.bf16.msra.mxu0 %v2250_v15 }
 0x3c8   : > { %1724 = vmatprep.subr.bf16.mxu0 %v2255_v16 }
 0x3cb   : > { %1725 = vmatpush3.bf16.msra.mxu0 %v2264_v17 }
 0x3cc   : > { %1726 = vmatprep.subr.bf16.mxu0 %v2269_v18 }
 0x3cf   : > { %1727 = vmatpush3.bf16.msra.mxu0 %v2279_v19 }
 0x3d0   : > { %1802 = vmatprep.subr.bf16.mxu0 %v2039_v30 }
 0x3d2   : > { %1536 = vmatmul.mubr.msk.bf16.vlgmr.msra.gmra.mrb[16].mxu0 %vm1535_vm14, %v2038_v27 }
 0x3d3   : > { %1804 = vmatprep.mubr.msk.bf16.mxu0 %vm2040_vm12, %v2039_v30  ;;  %vm1111_vm12 = vcmp.eq.s32.totalorder %v1110_v21, %v2290_v23  ;;  %1803 = vmatpush3.bf16.msra.mxu0 %v1903_v3  ;;  %v1912_v23 = vld [vmem:[%s2564_s4 + $0x24] ss:$8 sps:$4 sm:$0xff]  }
 0x3d4   : > { %vm1541_vm2 = vmpackc.low %vm1111_vm12, %vm1111_vm12  ;;  %v1918_v30 = vld [vmem:[%s2564_s4 + $0x44] ss:$8 sps:$4 sm:$0xff]  }
 0x485   : > { %v999_v62 = vpop.f32.mrb[12].mxu0 }
 0x486   : > { %v1005_v63 = vadd.f32 %v999_v62, %v903_v51  ;;  %v1794_v1 = vpop.f32.mrb[13].mxu0  ;;  %v1236_v51 = vld [vmem:[%s2565_s5] sm:$0x3] }
 0x487   : > { %v1002_v7 = vpop.f32.mrb[14].mxu0  ;;  %v1241_v53 = vrot.slane %v1236_v51, %v1240_v50  ;;  %v1245_v54 = vrot.slane %v1236_v51, %v1244_v52 }
 0x488   : > { %v1795_v20 = vpop.f32.mrb[15].mxu0 }
 0x4a5   : > { %v1728_v25 = vpop.f32.mrb[16].mxu0 }
 0x4a6   : > { %v1729_v26 = vpop.f32.mrb[17].mxu0 }
 0x4a7   : > { %v1730_v28 = vadd.f32 %v1729_v26, %v1728_v25  ;;  %v1731_v29 = vpop.f32.mrb[18].mxu0 }
 0x4a8   : > { %v1732_v31 = vpop.f32.mrb[19].mxu0 }
 0x4a9   : > { %v1057_v32 = vpack.c.bf16 %v1730_v28, %v1730_v28 }
 0x4ab   : > { %1799 = vmatmul.mubr.msk.bf16.vlgmr.msra.gmra.mrb[32].mxu1 %vm505_vm1, %v1057_v32 }
 0x4ac   : > { %1737 = vmatpush3.bf16.msra.mxu1 %v2181_v4  ;;  %1540 = vmatprep.mubr.msk.bf16.mxu1 %vm1539_vm0, %v2038_v27  ;;  %v1906_v4 = vld [vmem:[%s2564_s4 + $0x4] ss:$8 sps:$4 sm:$0xff]  }
 0x4ad   : > { %1738 = vmatprep.subr.bf16.mxu1 %v2187_v5  ;;  %1328 = vmatprep.subr.bf16.mxu0 %v1906_v4 }
 0x4b0   : > { %1739 = vmatpush3.bf16.msra.mxu1 %v2194_v6 }
 0x4b1   : > { %1740 = vmatprep.subr.bf16.mxu1 %v2201_v8 }
 0x4b4   : > { %1741 = vmatpush3.bf16.msra.mxu1 %v2209_v9 }
 0x4b5   : > { %1742 = vmatprep.subr.bf16.mxu1 %v2216_v10 }
 0x4b8   : > { %1743 = vmatpush3.bf16.msra.mxu1 %v2223_v11 }
 0x4b9   : > { %1744 = vmatprep.subr.bf16.mxu1 %v2230_v12 }
 0x4bc   : > { %1745 = vmatpush3.bf16.msra.mxu1 %v2236_v13 }
 0x4bd   : > { %1746 = vmatprep.subr.bf16.mxu1 %v2243_v14 }
 0x4c0   : > { %1747 = vmatpush3.bf16.msra.mxu1 %v2250_v15 }
 0x4c1   : > { %1748 = vmatprep.subr.bf16.mxu1 %v2255_v16  ;;  %v1904_v16 = vld [vmem:[%s2564_s4] ss:$8 sps:$4 sm:$0xff]  }
 0x4c4   : > { %1749 = vmatpush3.bf16.msra.mxu1 %v2264_v17 }
 0x4c5   : > { %1750 = vmatprep.subr.bf16.mxu1 %v2269_v18  ;;  %v1909_v18 = vld [vmem:[%s2564_s4 + $0x14] ss:$8 sps:$4 sm:$0xff]  }
 0x4c8   : > { %1751 = vmatpush3.bf16.msra.mxu1 %v2279_v19  ;;  %v1907_v19 = vld [vmem:[%s2564_s4 + $0x10] ss:$8 sps:$4 sm:$0xff]  }
 0x4cb   : > { %1542 = vmatmul.mubr.msk.bf16.vlgmr.msra.gmra.mrb[36].mxu1 %vm1541_vm2, %v2038_v27  ;;  %v1915_v27 = vld [vmem:[%s2564_s4 + $0x34] ss:$8 sps:$4 sm:$0xff]  }
 0x57e   : > { %v1101_v5 = vpop.f32.mrb[32].mxu1 }
 0x57f   : > { %v1107_v6 = vadd.f32 %v1101_v5, %v1005_v63  ;;  %v1800_v8 = vpop.f32.mrb[33].mxu1 }
 0x580   : > { %v1104_v9 = vpop.f32.mrb[34].mxu1 }
 0x581   : > { %v1801_v10 = vpop.f32.mrb[35].mxu1 }
 0x59e   : > { %v1752_v11 = vpop.f32.mrb[36].mxu1 }
 0x59f   : > { %v1753_v12 = vpop.f32.mrb[37].mxu1 }
 0x5a0   : > { %v1754_v13 = vadd.f32 %v1753_v12, %v1752_v11  ;;  %v1755_v14 = vpop.f32.mrb[38].mxu1 }
 0x5a1   : > { %v1756_v15 = vpop.f32.mrb[39].mxu1 }
 0x5a2   : > { %v1159_v17 = vpack.c.bf16 %v1754_v13, %v1754_v13 }
 0x5a4   : > { %1805 = vmatmul.mubr.msk.bf16.vlgmr.msra.gmra.mrb[20].mxu0 %vm505_vm1, %v1159_v17 }
 0x5a5   : > { %1329 = vmatpush1.bf16.msra.mxu0 %v1904_v16  ;;  %1360 = vmatprep.mubr.bf16.mxu0 %v2033_v0  ;;  %v1913_v0 = vld [vmem:[%s2564_s4 + $0x30] ss:$8 sps:$4 sm:$0xff]  }
 0x5a6   : > { %1330 = vmatprep.subr.bf16.mxu0 %v1909_v18 }
 0x5a9   : > { %1331 = vmatpush1.bf16.msra.mxu0 %v1907_v19 }
 0x5aa   : > { %1332 = vmatprep.subr.bf16.mxu0 %v1912_v23 }
 0x5ad   : > { %1333 = vmatpush1.bf16.msra.mxu0 %v1910_v24 }
 0x5ae   : > { %1334 = vmatprep.subr.bf16.mxu0 %v1915_v27 }
 0x5b1   : > { %1335 = vmatpush1.bf16.msra.mxu0 %v1913_v0 }
 0x5b2   : > { %1336 = vmatprep.subr.bf16.mxu0 %v1918_v30 }
 0x5b5   : > { %1337 = vmatpush1.bf16.msra.mxu0 %v1916_v33 }
 0x5b6   : > { %1338 = vmatprep.subr.bf16.mxu0 %v1921_v34 }
 0x5b9   : > { %1339 = vmatpush1.bf16.msra.mxu0 %v1919_v35 }
 0x5ba   : > { %1340 = vmatprep.subr.bf16.mxu0 %v1924_v36 }
 0x5bd   : > { %1341 = vmatpush1.bf16.msra.mxu0 %v1922_v37 }
 0x5be   : > { %1342 = vmatprep.subr.bf16.mxu0 %v1927_v38 }
 0x5c1   : > { %1343 = vmatpush1.bf16.msra.mxu0 %v1925_v39 }
 0x677   : > { %v1203_v40 = vpop.f32.mrb[20].mxu0 }
 0x678   : > { %v1209_v42 = vadd.f32 %v1203_v40, %v1107_v6  ;;  %v1806_v43 = vpop.f32.mrb[21].mxu0 }
 0x679   : > { %v1206_v44 = vpop.f32.mrb[22].mxu0 }
 0x67a   : > { %v1217_v45 = vadd.f32 %v1545_v41, %v1209_v42  ;;  %v1807_v46 = vpop.f32.mrb[23].mxu0 }
 0x67c   : > { %v1218_v47 = vmax.f32 %v1217_v45, 0.0 }
 0x67e   : > { %v1219_v48 = vpack.c.bf16 %v1218_v47, %v1218_v47 }
 0x680   : > { %1361 = vmatmul.mubr.bf16.vlgmr.msra.gmra.mrb[24].mxu0 %v1219_v48 }
 0x753   : > { %v1362_v55 = vpop.f32.mrb[24].mxu0 }
 0x754   : > { %v1363_v56 = vadd.f32 %v1362_v55, %v1241_v53  ;;  %v1364_v57 = vpop.f32.mrb[25].mxu0 }
 0x755   : > { %v1365_v58 = vadd.f32 %v1364_v57, %v1245_v54  ;;  %v1366_v59 = vpop.f32.mrb[26].mxu0 }
 0x756   : > { %v1367_v60 = vpop.f32.mrb[27].mxu0 }
 0x757   : > { %v1369_v61 = vmax.f32 %v1363_v56, %v1365_v58 }
 0x759   : > { %1370 = vmax.xlane.f32.xlu0 %v1369_v61 }
 0x7e6   : > { %v1371_v2 = vpop.xlane.xlu0 %1370 }
 0x7e7   : > { %v1372_v22 = vsub.f32 %v1363_v56, %v1371_v2  ;;  %v1373_v62 = vsub.f32 %v1365_v58, %v1371_v2 }
 0x7e9   : > { %v1374_v63 = vmul.f32 1.442695, %v1372_v22  ;;  %v1376_v1 = vmul.f32 1.442695, %v1373_v62 }
 0x7eb   : > { %1928 = vpow2.f32 %v1374_v63 }
 0x7ec   : > { %1930 = vpow2.f32 %v1376_v1 }
 0x7f5   : > { %v1929_v7 = vpop.eup %1928 }
 0x7f6   : > { %v1931_v20 = vpop.eup %1930 }
 0x7f7   : > { %v1378_v21 = vadd.f32 %v1931_v20, %v1929_v7 }
 0x7f9   : > { %1379 = vadd.xlane.f32.xlu1 %v1378_v21 }
 0x886   : > { %v1380_v25 = vpop.xlane.xlu1 %1379 }
 0x887   : > { %1932 = vlog2.f32 %v1380_v25 }
 0x891   : > { %v1933_v26 = vpop.eup %1932 }
 0x892   : > { %v1382_v28 = vmul.f32 0.6931472, %v1933_v26 }
 0x894   : > { %v1383_v29 = vsub.f32 %v1372_v22, %v1382_v28  ;;  %v1384_v31 = vsub.f32 %v1373_v62, %v1382_v28 }
 0x896   : > { %1385 = vst [vmem:[%s257_s13] sm:$0xff] %v1383_v29  ;;  %1386 = vst [vmem:[%s257_s13 + $0x8] sm:$0xff] %v1384_v31 }
 0x897   : > { %1975 = shalt.err (!%p1972_p7)
}
 0x898   : > { %s1976_s20 = scalar_lea.hbm %s2518_s15, 256  ;;  %s1980_s29 = scalar_lea.hbm %s2566_s6, 512 }
 0x899   : > { %p1977_p8 = scmp.ne.s32.totalorder %s2518_s15, %s1976_s20  ;;  %p1981_p1 = scmp.lt.u32.totalorder %s2518_s15, %s2566_s6 }
 0x89a   : > { %p1982_p0 = scmp.lt.u32.totalorder %s1980_s29, %s1976_s20  ;;  %p1984_p6 = scmp.lt.u32.totalorder %s1976_s20, %s2518_s15 }
 0x89b   : > { %p1978_p11 = pnand %p1977_p8, %p2577_p9 }
 0x89c   : > { %p1983_p5 = por %p1982_p0, %p1981_p1 }
 0x89d   : > { %p1979_p13 = pneg %p1978_p11 }
 0x89e   : > { %p1985_p10 = por %p1984_p6, %p1983_p5 }
 0x8a0   : > { %p1986_p12 = pnand %p1985_p10, %p1979_p13 }
 0x8a2   : > { %1989 = shalt.err (!%p1986_p12)
}
 0x8a3   : > { %1812 = dma.vmem_to_hbm [thread:$0]  (%p2577_p9), %s2520_s11, 256, %s2518_s15, %s1388_s16  }
 0x8a4 PF: > { %p1824_p2 = scmp.ge.s32.totalorder %s2028_s24, 2  ;;  %s1414_s13 = sand.u32 1, %s2016_s21  }
 0x8a5   : > { %p2578_p3 = scmp.ne.s32.totalorder %s2571_s8, 0  ;;  %s1415_s14 = scalar_lea.sflag [#allocation4], %s1414_s13 }
 0x8a7   : > { %p1819_p4 = pnand %p1824_p2, %p2578_p3 }
 0x8a9   : > { %2011 = dma.done.wait (!%p1819_p4), %s1415_s14, 256  }
 0x8aa   : > { %2013 = vsyncadd (!%p1819_p4), %s1415_s14, 4294967040  ;;  %p17_p7 = scmp.ge.s32.totalorder %s2105_s27, 4   ;;  %s2579_s21 = smov %s2020_s22 }
 0x8ab   : > { %s2580_s22 = smov %s2024_s23  ;;  %s2581_s23 = smov %s2116_s30 }
 0x8ac   : > { %s2582_s24 = smov %s2105_s27  ;;  %19 = sbr.rel (!%p17_p7) target bundleno = 4 (0x4), region = 84 }
 0x8b3   :  { %1420 = vsyncpa [#allocation3], 1 }
 0x8b4   :  { %1422 = vsyncpa [#allocation3 + $0x1], 1 }
 0x8b5   :  { %1423 = vsyncpa [#allocation4], 1 }
 0x8b6   :  { %1425 = vsyncpa [#allocation4 + $0x1], 1 }

</bundles_post_ra>
